<compile_context>
chip_gen: v7x
topology: tpu7x:2x2x1
jax: 0.10.0
libtpu: 0.0.40
codegen_flags: <defaults>
</compile_context>

<pallas_src>
import functools

import jax
import jax.numpy as jnp
from jax.experimental import pallas as pl
from jax.experimental.pallas import tpu as pltpu


def _round_up(x, m):
    return (x + m - 1) // m * m


# --------------------------------------------------------------------------
# Pallas kernel: LSTM recurrence over pre-projected gates, emitting h at the
# last valid timestep of each sequence (zeros for length == 0).
# --------------------------------------------------------------------------
def _lstm_recurrence_kernel(gx_ref, len_ref, w_hh_ref, out_ref, h_ref, c_ref):
    # gx_ref:   (1, N_tile, 4H)  x@W_ih + b for this timestep (cell cols pre-scaled by 2)
    # len_ref:  (N_tile, 1)      int32 valid lengths
    # w_hh_ref: (H, 4H)          hidden->gates weights (cell cols pre-scaled by 2)
    # out_ref:  (N_tile, H)      h at each sequence's last valid step
    # h_ref/c_ref: (N_tile, H)   f32 VMEM scratch, persistent across the T grid axis
    t = pl.program_id(1)
    H = w_hh_ref.shape[0]

    @pl.when(t == 0)
    def _():
        h_ref[...] = jnp.zeros_like(h_ref)
        c_ref[...] = jnp.zeros_like(c_ref)

    h = h_ref[...]
    c = c_ref[...]

    gates = gx_ref[0] + jnp.dot(h, w_hh_ref[...],
                                preferred_element_type=jnp.float32)   # (N_tile, 4H)

    # One full-width transcendental pass; PyTorch gate order: i, f, g, o.
    z = jax.nn.sigmoid(gates)
    i_g = z[:, 0:H]
    f_g = z[:, H:2 * H]
    g_g = 2.0 * z[:, 2 * H:3 * H] - 1.0        # tanh(g) via pre-scaled sigmoid
    o_g = z[:, 3 * H:4 * H]

    c_new = f_g * c + i_g * g_g
    h_new = o_g * jnp.tanh(c_new)

    # pack_padded_sequence semantics: state only advances while t < length.
    mask = t < len_ref[...]                     # (N_tile, 1) bool
    h_ref[...] = jnp.where(mask, h_new, h)
    c_ref[...] = jnp.where(mask, c_new, c)

    @pl.when(t == pl.num_programs(1) - 1)
    def _():
        out_ref[...] = h_ref[...]


def lstm_last_hidden(x_ntd, lengths, w_ih, w_hh, b, *, n_tile=256):
    """x_ntd: (N, T, D) batch-first; lengths: (N,) int; returns (N, H) f32."""
    N, T, D = x_ntd.shape
    H = w_hh.shape[0]
    G = 4 * H

    # Row tiling: multiple of 8 sublanes, capped so VMEM stays bounded.
    n_tile = min(n_tile, _round_up(N, 8))
    n_pad = _round_up(N, n_tile)

    x = x_ntd.astype(jnp.float32)
    lens = lengths.astype(jnp.int32)
    if n_pad != N:
        x = jnp.pad(x, ((0, n_pad - N), (0, 0), (0, 0)))
        lens = jnp.pad(lens, (0, n_pad - N))     # padded rows: length 0 -> h stays 0

    # Pre-scale the cell-gate (g) columns by 2 so tanh(g) = 2*sigmoid(2g) - 1
    # can be derived from the single full-width sigmoid inside the kernel.
    scale = jnp.ones((G,), jnp.float32).at[2 * H:3 * H].set(2.0)
    w_ih_s = w_ih.astype(jnp.float32) * scale[None, :]
    w_hh_s = w_hh.astype(jnp.float32) * scale[None, :]
    b_s = b.astype(jnp.float32).reshape(1, G) * scale[None, :]

    # Hoisted input projection: one big matmul over all timesteps, written
    # directly time-major (T, N_pad, 4H) so the recurrence kernel streams
    # contiguous per-timestep slabs.
    gates_x = jnp.einsum("ntd,dg->tng", x, w_ih_s) + b_s                # (T, N_pad, 4H)

    grid = (n_pad // n_tile, T)
    out = pl.pallas_call(
        _lstm_recurrence_kernel,
        out_shape=jax.ShapeDtypeStruct((n_pad, H), jnp.float32),
        grid_spec=pltpu.PrefetchScalarGridSpec(
            num_scalar_prefetch=0,
            grid=grid,
            in_specs=[
                pl.BlockSpec((1, n_tile, G), lambda n, t: (t, n, 0)),   # gate slab
                pl.BlockSpec((n_tile, 1), lambda n, t: (n, 0)),         # lengths
                pl.BlockSpec((H, G), lambda n, t: (0, 0)),              # W_hh (resident)
            ],
            out_specs=pl.BlockSpec((n_tile, H), lambda n, t: (n, 0)),
            scratch_shapes=[
                pltpu.VMEM((n_tile, H), jnp.float32),   # h
                pltpu.VMEM((n_tile, H), jnp.float32),   # c
            ],
        ),
        compiler_params=pltpu.CompilerParams(
            dimension_semantics=("parallel", "arbitrary")),
    )(gates_x, lens.reshape(n_pad, 1), w_hh_s)
    return out[:N]


# --------------------------------------------------------------------------
# Module wrapper: HierarchicalLSTMAggregator.forward
# --------------------------------------------------------------------------
def hierarchical_lstm_aggregator(features, sample_lengths, sentence_lengths,
                                 params, *, n_tile=256):
    """
    features:         (B, max_sents, max_words, word_dim) f32
    sample_lengths:   (B,)            int   (# valid sentences per sample)
    sentence_lengths: (B, max_sents)  int   (# valid words per sentence)
    returns:          (B, sample_lstm_hidden_dim) f32
    """
    B, S, W, D = features.shape
    H1 = params["w_hh_sent"].shape[0]

    # ---- sentence-level LSTM over words (all B*S sentences batched) ----
    sent_emb = lstm_last_hidden(
        features.reshape(B * S, W, D), sentence_lengths.reshape(B * S),
        params["w_ih_sent"], params["w_hh_sent"], params["b_sent"],
        n_tile=n_tile)                                                   # (B*S, H1)
    # nn.Dropout is identity at inference; invalid sentences are already zero.

    # ---- sample-level LSTM over sentence embeddings (small: batch = B) ----
    out = lstm_last_hidden(
        sent_emb.reshape(B, S, H1), sample_lengths,
        params["w_ih_samp"], params["w_hh_samp"], params["b_samp"],
        n_tile=n_tile)                                                   # (B, H2)
    return out


# --------------------------------------------------------------------------
# Pure-JAX reference (standard LSTM formulation, no Pallas) for correctness.
# --------------------------------------------------------------------------
def _lstm_ref(x_ntd, lengths, w_ih, w_hh, b):
    N, T, D = x_ntd.shape
    H = w_hh.shape[0]
    h = jnp.zeros((N, H), jnp.float32)
    c = jnp.zeros((N, H), jnp.float32)
    for t in range(T):
        gates = x_ntd[:, t, :] @ w_ih + h @ w_hh + b
        i_g = jax.nn.sigmoid(gates[:, :H])
        f_g = jax.nn.sigmoid(gates[:, H:2 * H])
        g_g = jnp.tanh(gates[:, 2 * H:3 * H])
        o_g = jax.nn.sigmoid(gates[:, 3 * H:])
        c_new = f_g * c + i_g * g_g
        h_new = o_g * jnp.tanh(c_new)
        mask = (t < lengths)[:, None]
        h = jnp.where(mask, h_new, h)
        c = jnp.where(mask, c_new, c)
    return h


def _reference_forward(features, sample_lengths, sentence_lengths, params):
    B, S, W, D = features.shape
    H1 = params["w_hh_sent"].shape[0]
    sent_emb = _lstm_ref(features.reshape(B * S, W, D),
                         sentence_lengths.reshape(B * S),
                         params["w_ih_sent"], params["w_hh_sent"], params["b_sent"])
    return _lstm_ref(sent_emb.reshape(B, S, H1), sample_lengths,
                     params["w_ih_samp"], params["w_hh_samp"], params["b_samp"])


# --------------------------------------------------------------------------
# Deterministic parameter init (PyTorch LSTM: uniform(-1/sqrt(H), 1/sqrt(H))).
# Weights stored pre-transposed: w_ih (D, 4H), w_hh (H, 4H), bias (1, 4H).
# --------------------------------------------------------------------------
def init_params(key, word_dim, h_sent, h_samp):
    ks = jax.random.split(key, 8)

    def u(k, shape, h):
        bound = 1.0 / jnp.sqrt(h)
        return jax.random.uniform(k, shape, jnp.float32, -bound, bound)

    return {
        "w_ih_sent": u(ks[0], (word_dim, 4 * h_sent), h_sent),
        "w_hh_sent": u(ks[1], (h_sent, 4 * h_sent), h_sent),
        "b_sent":    u(ks[2], (1, 4 * h_sent), h_sent) + u(ks[3], (1, 4 * h_sent), h_sent),
        "w_ih_samp": u(ks[4], (h_sent, 4 * h_samp), h_samp),
        "w_hh_samp": u(ks[5], (h_samp, 4 * h_samp), h_samp),
        "b_samp":    u(ks[6], (1, 4 * h_samp), h_samp) + u(ks[7], (1, 4 * h_samp), h_samp),
    }


if __name__ == "__main__":
    B, S, W, D = 2, 4, 8, 32            # batch, max_sents, max_words, word_dim
    H1, H2 = 32, 32                     # sentence / sample LSTM hidden dims (4H = 128 lanes)

    key = jax.random.PRNGKey(0)
    k_feat, k_slen, k_wlen, k_param = jax.random.split(key, 4)

    features = jax.random.normal(k_feat, (B, S, W, D), jnp.float32)
    sample_lengths = jax.random.randint(k_slen, (B,), 1, S + 1)          # (B,)
    sentence_lengths = jax.random.randint(k_wlen, (B, S), 0, W + 1)      # (B, S), may include 0
    params = init_params(k_param, D, H1, H2)

    fwd = jax.jit(functools.partial(hierarchical_lstm_aggregator, n_tile=256))
    out = fwd(features, sample_lengths, sentence_lengths, params)
    out = jax.block_until_ready(out)

    ref = _reference_forward(features, sample_lengths, sentence_lengths, params)
    assert out.shape == (B, H2)
    assert jnp.allclose(out, ref, atol=1e-4, rtol=1e-4), "mismatch vs reference"

    print("KERNEL_OK")
</pallas_src>

<mosaic_0001>
module attributes {stable_mosaic.version = 11 : i64} {
  func.func @_lstm_recurrence_kernel(%arg0: i32, %arg1: i32, %arg2: memref<1x8x128xf32, #tpu.memory_space<vmem>>, %arg3: memref<8x1xi32, #tpu.memory_space<vmem>>, %arg4: memref<32x128xf32, #tpu.memory_space<vmem>>, %arg5: memref<8x32xf32, #tpu.memory_space<vmem>>, %arg6: memref<8x32xf32, #tpu.memory_space<vmem>>, %arg7: memref<8x32xf32, #tpu.memory_space<vmem>>) attributes {dimension_semantics = [#tpu.dimension_semantics<parallel>, #tpu.dimension_semantics<arbitrary>], iteration_bounds = array<i64: 1, 8>, scalar_prefetch = 0 : i64, scratch_operands = 2 : i64, tpu.core_type = #tpu.core_type<tc>, window_params = [{transform_indices = @transform_0, window_bounds = array<i64: 1, 8, 128>}, {transform_indices = @transform_1, window_bounds = array<i64: 8, 1>}, {pipeline_mode = #tpu.pipeline_mode<synchronous>, transform_indices = @transform_2, window_bounds = array<i64: 32, 128>}, {transform_indices = @transform_3, window_bounds = array<i64: 8, 32>}]} {
    %c0_i32 = arith.constant 0 : i32
    %0 = arith.cmpi eq, %arg1, %c0_i32 : i32
    %1 = arith.extui %0 : i1 to i32
    %c0_i32_0 = arith.constant 0 : i32
    %2 = arith.cmpi ne, %1, %c0_i32_0 : i32
    scf.if %2 {
      %cst_19 = arith.constant 0.000000e+00 : f32
      %42 = vector.broadcast %cst_19 : f32 to vector<8x32xf32>
      %c0_20 = arith.constant 0 : index
      %c0_21 = arith.constant 0 : index
      %43 = vector.load %arg6[%c0_20, %c0_21] : memref<8x32xf32, #tpu.memory_space<vmem>>, vector<8x32xf32>
      tpu.vector_store %arg6[%c0_20, %c0_21], %42 {strides = array<i32>} : memref<8x32xf32, #tpu.memory_space<vmem>>, vector<8x32xf32>,
      %cst_22 = arith.constant 0.000000e+00 : f32
      %44 = vector.broadcast %cst_22 : f32 to vector<8x32xf32>
      %c0_23 = arith.constant 0 : index
      %c0_24 = arith.constant 0 : index
      %45 = vector.load %arg7[%c0_23, %c0_24] : memref<8x32xf32, #tpu.memory_space<vmem>>, vector<8x32xf32>
      tpu.vector_store %arg7[%c0_23, %c0_24], %44 {strides = array<i32>} : memref<8x32xf32, #tpu.memory_space<vmem>>, vector<8x32xf32>,
    } else {
    }
    %c0 = arith.constant 0 : index
    %c0_1 = arith.constant 0 : index
    %3 = vector.load %arg6[%c0, %c0_1] : memref<8x32xf32, #tpu.memory_space<vmem>>, vector<8x32xf32>
    %c0_2 = arith.constant 0 : index
    %c0_3 = arith.constant 0 : index
    %4 = vector.load %arg7[%c0_2, %c0_3] : memref<8x32xf32, #tpu.memory_space<vmem>>, vector<8x32xf32>
    %c0_4 = arith.constant 0 : index
    %c0_5 = arith.constant 0 : index
    %c0_6 = arith.constant 0 : index
    %5 = vector.load %arg2[%c0_4, %c0_5, %c0_6] : memref<1x8x128xf32, #tpu.memory_space<vmem>>, vector<1x8x128xf32>
    %6 = vector.shape_cast %5 : vector<1x8x128xf32> to vector<8x128xf32>
    %c0_7 = arith.constant 0 : index
    %c0_8 = arith.constant 0 : index
    %7 = vector.load %arg4[%c0_7, %c0_8] : memref<32x128xf32, #tpu.memory_space<vmem>>, vector<32x128xf32>
    %cst = arith.constant dense<0.000000e+00> : vector<8x128xf32>
    %8 = tpu.matmul %3, %7, %cst {dimension_numbers = #tpu.dot_dimension_numbers<[1], [0], [0], [1], [0, 0, 1, 1], [], []>} : vector<8x32xf32>, vector<32x128xf32>, vector<8x128xf32> -> vector<8x128xf32>
    %9 = arith.addf %6, %8 : vector<8x128xf32>
    %10 = arith.negf %9 : vector<8x128xf32>
    %11 = math.exp %10 : vector<8x128xf32>
    %cst_9 = arith.constant 1.000000e+00 : f32
    %12 = vector.broadcast %cst_9 : f32 to vector<8x128xf32>
    %13 = arith.addf %12, %11 : vector<8x128xf32>
    %14 = arith.divf %12, %13 : vector<8x128xf32>
    %15 = vector.extract_strided_slice %14 {offsets = [0, 0], sizes = [8, 32], strides = [1, 1]} : vector<8x128xf32> to vector<8x32xf32>
    %16 = vector.extract_strided_slice %14 {offsets = [0, 32], sizes = [8, 32], strides = [1, 1]} : vector<8x128xf32> to vector<8x32xf32>
    %17 = vector.extract_strided_slice %14 {offsets = [0, 64], sizes = [8, 32], strides = [1, 1]} : vector<8x128xf32> to vector<8x32xf32>
    %cst_10 = arith.constant 2.000000e+00 : f32
    %18 = vector.broadcast %cst_10 : f32 to vector<8x32xf32>
    %19 = arith.mulf %18, %17 : vector<8x32xf32>
    %cst_11 = arith.constant 1.000000e+00 : f32
    %20 = vector.broadcast %cst_11 : f32 to vector<8x32xf32>
    %21 = arith.subf %19, %20 : vector<8x32xf32>
    %22 = vector.extract_strided_slice %14 {offsets = [0, 96], sizes = [8, 32], strides = [1, 1]} : vector<8x128xf32> to vector<8x32xf32>
    %23 = arith.mulf %16, %4 : vector<8x32xf32>
    %24 = arith.mulf %15, %21 : vector<8x32xf32>
    %25 = arith.addf %23, %24 : vector<8x32xf32>
    %26 = math.tanh %25 : vector<8x32xf32>
    %27 = arith.mulf %22, %26 : vector<8x32xf32>
    %c0_12 = arith.constant 0 : index
    %c0_13 = arith.constant 0 : index
    %28 = vector.load %arg3[%c0_12, %c0_13] : memref<8x1xi32, #tpu.memory_space<vmem>>, vector<8x1xi32>
    %29 = vector.broadcast %arg1 : i32 to vector<8x1xi32>
    %30 = arith.cmpi slt, %29, %28 : vector<8x1xi32>
    %31 = vector.shape_cast %30 : vector<8x1xi1> to vector<8x1xi1>
    %32 = vector.broadcast %31 : vector<8x1xi1> to vector<8x32xi1>
    %33 = arith.select %32, %27, %3 : vector<8x32xi1>, vector<8x32xf32>
    %c0_14 = arith.constant 0 : index
    %c0_15 = arith.constant 0 : index
    %34 = vector.load %arg6[%c0_14, %c0_15] : memref<8x32xf32, #tpu.memory_space<vmem>>, vector<8x32xf32>
    tpu.vector_store %arg6[%c0_14, %c0_15], %33 {strides = array<i32>} : memref<8x32xf32, #tpu.memory_space<vmem>>, vector<8x32xf32>,
    %35 = vector.shape_cast %30 : vector<8x1xi1> to vector<8x1xi1>
    %36 = vector.broadcast %35 : vector<8x1xi1> to vector<8x32xi1>
    %37 = arith.select %36, %25, %4 : vector<8x32xi1>, vector<8x32xf32>
    %c0_16 = arith.constant 0 : index
    %c0_17 = arith.constant 0 : index
    %38 = vector.load %arg7[%c0_16, %c0_17] : memref<8x32xf32, #tpu.memory_space<vmem>>, vector<8x32xf32>
    tpu.vector_store %arg7[%c0_16, %c0_17], %37 {strides = array<i32>} : memref<8x32xf32, #tpu.memory_space<vmem>>, vector<8x32xf32>,
    %c7_i32 = arith.constant 7 : i32
    %39 = arith.cmpi eq, %arg1, %c7_i32 : i32
    %40 = arith.extui %39 : i1 to i32
    %c0_i32_18 = arith.constant 0 : i32
    %41 = arith.cmpi ne, %40, %c0_i32_18 : i32
    scf.if %41 {
      %c0_19 = arith.constant 0 : index
      %c0_20 = arith.constant 0 : index
      %42 = vector.load %arg6[%c0_19, %c0_20] : memref<8x32xf32, #tpu.memory_space<vmem>>, vector<8x32xf32>
      %c0_21 = arith.constant 0 : index
      %c0_22 = arith.constant 0 : index
      %43 = vector.load %arg5[%c0_21, %c0_22] : memref<8x32xf32, #tpu.memory_space<vmem>>, vector<8x32xf32>
      tpu.vector_store %arg5[%c0_21, %c0_22], %42 {strides = array<i32>} : memref<8x32xf32, #tpu.memory_space<vmem>>, vector<8x32xf32>,
    } else {
    }
    return
  }
  func.func @transform_0(%arg0: i32, %arg1: i32) -> (i32, i32, i32) {
    %c0_i32 = arith.constant 0 : i32
    %c0_i32_0 = arith.constant 0 : i32
    return %arg1, %arg0, %c0_i32 : i32, i32, i32
  }
  func.func @transform_1(%arg0: i32, %arg1: i32) -> (i32, i32) {
    %c0_i32 = arith.constant 0 : i32
    %c0_i32_0 = arith.constant 0 : i32
    return %arg0, %c0_i32 : i32, i32
  }
  func.func @transform_2(%arg0: i32, %arg1: i32) -> (i32, i32) {
    %c0_i32 = arith.constant 0 : i32
    %c0_i32_0 = arith.constant 0 : i32
    %c0_i32_1 = arith.constant 0 : i32
    return %c0_i32, %c0_i32_0 : i32, i32
  }
  func.func @transform_3(%arg0: i32, %arg1: i32) -> (i32, i32) {
    %c0_i32 = arith.constant 0 : i32
    %c0_i32_0 = arith.constant 0 : i32
    return %arg0, %c0_i32 : i32, i32
  }
}

module attributes {stable_mosaic.version = 11 : i64} {
  func.func @_lstm_recurrence_kernel(%arg0: i32, %arg1: i32, %arg2: memref<1x8x128xf32, #tpu.memory_space<vmem>>, %arg3: memref<8x1xi32, #tpu.memory_space<vmem>>, %arg4: memref<32x128xf32, #tpu.memory_space<vmem>>, %arg5: memref<8x32xf32, #tpu.memory_space<vmem>>, %arg6: memref<8x32xf32, #tpu.memory_space<vmem>>, %arg7: memref<8x32xf32, #tpu.memory_space<vmem>>) attributes {dimension_semantics = [#tpu.dimension_semantics<parallel>, #tpu.dimension_semantics<arbitrary>], iteration_bounds = array<i64: 1, 4>, scalar_prefetch = 0 : i64, scratch_operands = 2 : i64, tpu.core_type = #tpu.core_type<tc>, window_params = [{transform_indices = @transform_0, window_bounds = array<i64: 1, 8, 128>}, {transform_indices = @transform_1, window_bounds = array<i64: 8, 1>}, {pipeline_mode = #tpu.pipeline_mode<synchronous>, transform_indices = @transform_2, window_bounds = array<i64: 32, 128>}, {transform_indices = @transform_3, window_bounds = array<i64: 8, 32>}]} {
    %c0_i32 = arith.constant 0 : i32
    %0 = arith.cmpi eq, %arg1, %c0_i32 : i32
    %1 = arith.extui %0 : i1 to i32
    %c0_i32_0 = arith.constant 0 : i32
    %2 = arith.cmpi ne, %1, %c0_i32_0 : i32
    scf.if %2 {
      %cst_19 = arith.constant 0.000000e+00 : f32
      %42 = vector.broadcast %cst_19 : f32 to vector<8x32xf32>
      %c0_20 = arith.constant 0 : index
      %c0_21 = arith.constant 0 : index
      %43 = vector.load %arg6[%c0_20, %c0_21] : memref<8x32xf32, #tpu.memory_space<vmem>>, vector<8x32xf32>
      tpu.vector_store %arg6[%c0_20, %c0_21], %42 {strides = array<i32>} : memref<8x32xf32, #tpu.memory_space<vmem>>, vector<8x32xf32>,
      %cst_22 = arith.constant 0.000000e+00 : f32
      %44 = vector.broadcast %cst_22 : f32 to vector<8x32xf32>
      %c0_23 = arith.constant 0 : index
      %c0_24 = arith.constant 0 : index
      %45 = vector.load %arg7[%c0_23, %c0_24] : memref<8x32xf32, #tpu.memory_space<vmem>>, vector<8x32xf32>
      tpu.vector_store %arg7[%c0_23, %c0_24], %44 {strides = array<i32>} : memref<8x32xf32, #tpu.memory_space<vmem>>, vector<8x32xf32>,
    } else {
    }
    %c0 = arith.constant 0 : index
    %c0_1 = arith.constant 0 : index
    %3 = vector.load %arg6[%c0, %c0_1] : memref<8x32xf32, #tpu.memory_space<vmem>>, vector<8x32xf32>
    %c0_2 = arith.constant 0 : index
    %c0_3 = arith.constant 0 : index
    %4 = vector.load %arg7[%c0_2, %c0_3] : memref<8x32xf32, #tpu.memory_space<vmem>>, vector<8x32xf32>
    %c0_4 = arith.constant 0 : index
    %c0_5 = arith.constant 0 : index
    %c0_6 = arith.constant 0 : index
    %5 = vector.load %arg2[%c0_4, %c0_5, %c0_6] : memref<1x8x128xf32, #tpu.memory_space<vmem>>, vector<1x8x128xf32>
    %6 = vector.shape_cast %5 : vector<1x8x128xf32> to vector<8x128xf32>
    %c0_7 = arith.constant 0 : index
    %c0_8 = arith.constant 0 : index
    %7 = vector.load %arg4[%c0_7, %c0_8] : memref<32x128xf32, #tpu.memory_space<vmem>>, vector<32x128xf32>
    %cst = arith.constant dense<0.000000e+00> : vector<8x128xf32>
    %8 = tpu.matmul %3, %7, %cst {dimension_numbers = #tpu.dot_dimension_numbers<[1], [0], [0], [1], [0, 0, 1, 1], [], []>} : vector<8x32xf32>, vector<32x128xf32>, vector<8x128xf32> -> vector<8x128xf32>
    %9 = arith.addf %6, %8 : vector<8x128xf32>
    %10 = arith.negf %9 : vector<8x128xf32>
    %11 = math.exp %10 : vector<8x128xf32>
    %cst_9 = arith.constant 1.000000e+00 : f32
    %12 = vector.broadcast %cst_9 : f32 to vector<8x128xf32>
    %13 = arith.addf %12, %11 : vector<8x128xf32>
    %14 = arith.divf %12, %13 : vector<8x128xf32>
    %15 = vector.extract_strided_slice %14 {offsets = [0, 0], sizes = [8, 32], strides = [1, 1]} : vector<8x128xf32> to vector<8x32xf32>
    %16 = vector.extract_strided_slice %14 {offsets = [0, 32], sizes = [8, 32], strides = [1, 1]} : vector<8x128xf32> to vector<8x32xf32>
    %17 = vector.extract_strided_slice %14 {offsets = [0, 64], sizes = [8, 32], strides = [1, 1]} : vector<8x128xf32> to vector<8x32xf32>
    %cst_10 = arith.constant 2.000000e+00 : f32
    %18 = vector.broadcast %cst_10 : f32 to vector<8x32xf32>
    %19 = arith.mulf %18, %17 : vector<8x32xf32>
    %cst_11 = arith.constant 1.000000e+00 : f32
    %20 = vector.broadcast %cst_11 : f32 to vector<8x32xf32>
    %21 = arith.subf %19, %20 : vector<8x32xf32>
    %22 = vector.extract_strided_slice %14 {offsets = [0, 96], sizes = [8, 32], strides = [1, 1]} : vector<8x128xf32> to vector<8x32xf32>
    %23 = arith.mulf %16, %4 : vector<8x32xf32>
    %24 = arith.mulf %15, %21 : vector<8x32xf32>
    %25 = arith.addf %23, %24 : vector<8x32xf32>
    %26 = math.tanh %25 : vector<8x32xf32>
    %27 = arith.mulf %22, %26 : vector<8x32xf32>
    %c0_12 = arith.constant 0 : index
    %c0_13 = arith.constant 0 : index
    %28 = vector.load %arg3[%c0_12, %c0_13] : memref<8x1xi32, #tpu.memory_space<vmem>>, vector<8x1xi32>
    %29 = vector.broadcast %arg1 : i32 to vector<8x1xi32>
    %30 = arith.cmpi slt, %29, %28 : vector<8x1xi32>
    %31 = vector.shape_cast %30 : vector<8x1xi1> to vector<8x1xi1>
    %32 = vector.broadcast %31 : vector<8x1xi1> to vector<8x32xi1>
    %33 = arith.select %32, %27, %3 : vector<8x32xi1>, vector<8x32xf32>
    %c0_14 = arith.constant 0 : index
    %c0_15 = arith.constant 0 : index
    %34 = vector.load %arg6[%c0_14, %c0_15] : memref<8x32xf32, #tpu.memory_space<vmem>>, vector<8x32xf32>
    tpu.vector_store %arg6[%c0_14, %c0_15], %33 {strides = array<i32>} : memref<8x32xf32, #tpu.memory_space<vmem>>, vector<8x32xf32>,
    %35 = vector.shape_cast %30 : vector<8x1xi1> to vector<8x1xi1>
    %36 = vector.broadcast %35 : vector<8x1xi1> to vector<8x32xi1>
    %37 = arith.select %36, %25, %4 : vector<8x32xi1>, vector<8x32xf32>
    %c0_16 = arith.constant 0 : index
    %c0_17 = arith.constant 0 : index
    %38 = vector.load %arg7[%c0_16, %c0_17] : memref<8x32xf32, #tpu.memory_space<vmem>>, vector<8x32xf32>
    tpu.vector_store %arg7[%c0_16, %c0_17], %37 {strides = array<i32>} : memref<8x32xf32, #tpu.memory_space<vmem>>, vector<8x32xf32>,
    %c3_i32 = arith.constant 3 : i32
    %39 = arith.cmpi eq, %arg1, %c3_i32 : i32
    %40 = arith.extui %39 : i1 to i32
    %c0_i32_18 = arith.constant 0 : i32
    %41 = arith.cmpi ne, %40, %c0_i32_18 : i32
    scf.if %41 {
      %c0_19 = arith.constant 0 : index
      %c0_20 = arith.constant 0 : index
      %42 = vector.load %arg6[%c0_19, %c0_20] : memref<8x32xf32, #tpu.memory_space<vmem>>, vector<8x32xf32>
      %c0_21 = arith.constant 0 : index
      %c0_22 = arith.constant 0 : index
      %43 = vector.load %arg5[%c0_21, %c0_22] : memref<8x32xf32, #tpu.memory_space<vmem>>, vector<8x32xf32>
      tpu.vector_store %arg5[%c0_21, %c0_22], %42 {strides = array<i32>} : memref<8x32xf32, #tpu.memory_space<vmem>>, vector<8x32xf32>,
    } else {
    }
    return
  }
  func.func @transform_0(%arg0: i32, %arg1: i32) -> (i32, i32, i32) {
    %c0_i32 = arith.constant 0 : i32
    %c0_i32_0 = arith.constant 0 : i32
    return %arg1, %arg0, %c0_i32 : i32, i32, i32
  }
  func.func @transform_1(%arg0: i32, %arg1: i32) -> (i32, i32) {
    %c0_i32 = arith.constant 0 : i32
    %c0_i32_0 = arith.constant 0 : i32
    return %arg0, %c0_i32 : i32, i32
  }
  func.func @transform_2(%arg0: i32, %arg1: i32) -> (i32, i32) {
    %c0_i32 = arith.constant 0 : i32
    %c0_i32_0 = arith.constant 0 : i32
    %c0_i32_1 = arith.constant 0 : i32
    return %c0_i32, %c0_i32_0 : i32, i32
  }
  func.func @transform_3(%arg0: i32, %arg1: i32) -> (i32, i32) {
    %c0_i32 = arith.constant 0 : i32
    %c0_i32_0 = arith.constant 0 : i32
    return %arg0, %c0_i32 : i32, i32
  }
}

</mosaic_0001>

<bundles_post_ra>
// kernel: hierarchical_lstm_aggregator.2
= control target key start
LH: loop header
LB: loop body
LE: loop exit
PB: predicated region body
PF: predicated region fallthrough
CT: control target
= control target key end

     0   :  { %s558_s12 = smov 0   ;;  %s560_s13 = smov 0   ;;  %s617_s0 = inlined_call_operand.vmem [shape: f32[8,8,128], index: 0, kind: input, shape index: {}]   ;;  %s618_s1 = inlined_call_operand.vmem [shape: s32[8,1], index: 1, kind: input, shape index: {}]   ;;  %s619_s2 = inlined_call_operand.vmem [shape: f32[32,128], index: 2, kind: input, shape index: {}]   ;;  %s620_s3 = inlined_call_operand.vmem [shape: f32[8,32], index: 3, kind: output, shape index: {}]  }
   0x1   :  { %s562_s14 = smov 0  }
   0x2 LB: > { %s22_s15 = sadd.s32 1, %s524_s13  ;;  %p434_p0 = scmp.ge.s32.totalorder %s528_s14, 1  ;;  %s528_s14 = sphi %s562_s14, %s13_s14   ;;  %s524_s13 = sphi %s560_s13, %s622_s13   ;;  %s520_s12 = sphi %s558_s12, %s621_s12  }
   0x3   : > { %p23_p1 = scmp.ge.s32.totalorder %s22_s15, 8  ;;  %p162_p2 = scmp.lt.s32.totalorder %s528_s14, 9 }
   0x5   : > { %s624_s15 = smov (%p23_p1, %s22_s15), 0  ;;  %p163_p3 = pnand %p434_p0, %p162_p2 }
   0x6   : > { %p191_p4 = scmp.lt.s32.totalorder (!%p163_p3), %s520_s12, 7  ;;  %p436_p5 = scmp.ne.s32.totalorder (!%p163_p3), %s520_s12, 0 }
   0x7   : > { %166 = sbr.rel (%p163_p3) target bundleno = 763 (0x2fb), region = 32 }
   0xe   : > { %s192_s16 = scalar_select %p191_p4, %s520_s12, 7 }
   0xf   : > { %209 = sbr.rel (%p436_p5) target bundleno = 22 (0x16), region = 36  ;;  %vm210_vm0 = vcmask (!%p436_p5), 261120   ;;  %v530_v0 = vmov (!%p436_p5), 0.0  }
  0x10   : > { %s435_s17 = sshll.u32 %s192_s16, 3  ;;  %211 = vst.msk [vmem:[#allocation2] sm:$0xff] (!%p436_p5), %vm210_vm0, %v530_v0  ;;  %212 = vst.msk [vmem:[#allocation3] sm:$0xff] (!%p436_p5), %vm210_vm0, %v530_v0 }
  0x11   : > { %s197_s20 = scalar_lea.vmem %s617_s0, %s435_s17 }
  0x16 PF: > { %v216_v1 = vld [vmem:[%s619_s2] sm:$0xff]  ;;  %v217_v2 = vld [vmem:[%s619_s2 + $0x8] sm:$0xff]  ;;  %v218_v3 = vld [vmem:[%s619_s2 + $0x10] sm:$0xff]  ;;  %v531_v4 = vmov 0.0|0.0   ;;  %vm532_vm1 = vmmov 0   ;;  %v533_v7 = vmov 0.0   ;;  %v325_v23 = vstv %s520_s12 }
  0x17   : > { %460 = vmatprep.subr.bf16.mxu0 %v531_v4  ;;  %v461_v5 = vpack.c.bf16 %v217_v2, %v216_v1  ;;  %v219_v6 = vld [vmem:[%s619_s2 + $0x18] sm:$0xff]  ;;  %457 = vmatprep.mubr.msk.f32.mxu0 %vm532_vm1, %v533_v7  ;;  %v213_v9 = vld [vmem:[#allocation2] sm:$0xff]  ;;  %vm220_vm2 = vcmask 261120   ;;  %v534_v17 = vmov 0   ;;  %s535_s29 = smov 64   ;;  %v214_v21 = vld [vmem:[#allocation3] sm:$0xff] }
  0x18   : > { %v464_v8 = vpack.c.bf16 %v219_v6, %v218_v3  ;;  %v215_v10 = vld [vmem:[%s197_s20] sm:$0xff]  ;;  %498 = vset.pattern.permute.xlu1 %v534_v17  ;;  %499 = vset.pattern.permute.xlu0 %v534_v17  ;;  %s536_s30 = smov 32   ;;  %s537_s6 = smov 96  }
  0x19   : > { %462 = vmatpush3.bf16.msra.mxu0 %v461_v5  ;;  %v324_v22 = vld [vmem:[%s618_s1] sm:$0xff]  ;;  %p440_p6 = scmp.ne.s32.totalorder %s520_s12, 7 }
  0x1a   : > { %463 = vmatprep.subr.bf16.mxu0 %v531_v4  ;;  %vm326_vm3 = vcmp.lt.s32.totalorder %v325_v23, %v324_v22 }
  0x1b   : > { %v327_v26 = vsel %vm326_vm3, 1, %v534_v17 }
  0x1d   : > { %465 = vmatpush3.bf16.msra.mxu0 %v464_v8 }
  0x20   : > { %458 = vmatmul.mubr.msk.f32.vlgmr.msra.gmra.mrb[0].mxu0 %vm220_vm2, %v213_v9 }
  0xf3   : > { %v290_v11 = vpop.f32.mrb[0].mxu0 }
  0xf4   : > { %v294_v12 = vadd.f32 %v290_v11, %v215_v10  ;;  %v459_v13 = vpop.f32.mrb[1].mxu0 }
  0xf6   : > { %v438_v14 = vmul.f32 -1.442695, %v294_v12 }
  0xf8   : > { %500 = vpow2.f32 %v438_v14 }
 0x102   : > { %v501_v15 = vpop.eup %500 }
 0x103   : > { %v298_v16 = vadd.f32 1.0, %v501_v15 }
 0x105   : > { %502 = vrcp.f32 %v298_v16 }
 0x10f   : > { %v503_v18 = vpop.eup %502 }
 0x110   : > { %v301_v19 = vmul.f32 2.0, %v503_v18 }
 0x112   : > { %v439_v20 = vadd.f32 -1.0, %v301_v19 }
 0x114   : > { %309 = vrot.lane.b32.xlu0 %v439_v20, %s535_s29 }
 0x118   : > { %304 = vrot.lane.b32.xlu0 %v214_v21, %s536_s30 }
 0x186   : > { %v310_v24 = vpop.permute.xlu0 %309 }
 0x187   : > { %v312_v25 = vmul.f32 %v503_v18, %v310_v24 }
 0x189   : > { %314 = vrot.lane.b32.xlu1 %v312_v25, %s536_s30 }
 0x18a   : > { %v305_v27 = vpop.permute.xlu0 %304 }
 0x18b   : > { %v307_v28 = vmul.f32 %v503_v18, %v305_v27 }
 0x18d   : > { %329 = vperm.xlu1 %498, %v327_v26  }
 0x191   : > { %332 = vrot.lane.b32.xlu1 %v213_v9, %s537_s6 }
 0x1fb   : > { %v315_v29 = vpop.permute.xlu1 %314 }
 0x1fc   : > { %v317_v30 = vadd.f32 %v315_v29, %v307_v28 }
 0x1fe   : > { %504 = vtanh.f32 %v317_v30 }
 0x208   : > { %v505_v31 = vpop.eup %504 }
 0x209   : > { %320 = vrot.lane.b32.xlu0 %v505_v31, %s535_s29 }
 0x20c   : > { %v330_v32 = vpop.permute.xlu1 %329 }
 0x20d   : > { %vm331_vm4 = vcmp.eq.s32.totalorder %v330_v32, 1 }
 0x20e   : > { %v341_v33 = vsel %vm331_vm4, %v317_v30, %v305_v27 }
 0x20f   : > { %343 = vrot.lane.b32.xlu1 %v341_v33, %s537_s6 }
 0x210   : > { %v333_v35 = vpop.permute.xlu1 %332 }
 0x27b   : > { %v321_v34 = vpop.permute.xlu0 %320 }
 0x27c   : > { %v323_v36 = vmul.f32 %v503_v18, %v321_v34 }
 0x27e   : > { %v335_v37 = vsel %vm331_vm4, %v323_v36, %v333_v35 }
 0x27f   : > { %337 = vrot.lane.b32.xlu0 %v335_v37, %s536_s30 }
 0x281   : > { %v344_v38 = vpop.permute.xlu1 %343 }
 0x282   : > { %346 = vst.msk [vmem:[#allocation3] sm:$0xff] %vm220_vm2, %v344_v38 }
 0x2ec   : > { %350 = sbr.rel (%p440_p6) target bundleno = 763 (0x2fb), region = 40 }
 0x2f1   : > { %v338_v39 = vpop.permute.xlu0 %337 }
 0x2f2   : > { %340 = vst.msk [vmem:[#allocation2] sm:$0xff] %vm220_vm2, %v338_v39 }
 0x2f9   : > { %v351_v40 = vld [vmem:[#allocation2] sm:$0xff] }
 0x2fa   : > { %352 = vst.msk [vmem:[%s620_s3] sm:$0xff] %vm220_vm2, %v351_v40 }
 0x2fb PF: > { %s13_s14 = sadd.s32 1, %s528_s14   ;;  %s621_s12 = smov %s524_s13 }
 0x2fc   : > { %p10_p7 = scmp.ge.s32.totalorder %s13_s14, 10   ;;  %s622_s13 = smov %s624_s15 }
 0x2fe   :  { %12 = sbr.rel (!%p10_p7) target bundleno = 2 (0x2), region = 73 }

// kernel: hierarchical_lstm_aggregator.3
= control target key start
LH: loop header
LB: loop body
LE: loop exit
PB: predicated region body
PF: predicated region fallthrough
CT: control target
= control target key end

     0   :  { %s558_s12 = smov 0   ;;  %s560_s13 = smov 0   ;;  %s617_s0 = inlined_call_operand.vmem [shape: f32[4,8,128], index: 0, kind: input, shape index: {}]   ;;  %s618_s1 = inlined_call_operand.vmem [shape: s32[8,1], index: 1, kind: input, shape index: {}]   ;;  %s619_s2 = inlined_call_operand.vmem [shape: f32[32,128], index: 2, kind: input, shape index: {}]   ;;  %s620_s3 = inlined_call_operand.vmem [shape: f32[8,32], index: 3, kind: output, shape index: {}]  }
   0x1   :  { %s562_s14 = smov 0  }
   0x2 LB: > { %s22_s15 = sadd.s32 1, %s524_s13  ;;  %p434_p0 = scmp.ge.s32.totalorder %s528_s14, 1  ;;  %s528_s14 = sphi %s562_s14, %s13_s14   ;;  %s524_s13 = sphi %s560_s13, %s622_s13   ;;  %s520_s12 = sphi %s558_s12, %s621_s12  }
   0x3   : > { %p23_p1 = scmp.ge.s32.totalorder %s22_s15, 4  ;;  %p162_p2 = scmp.lt.s32.totalorder %s528_s14, 5 }
   0x5   : > { %s624_s15 = smov (%p23_p1, %s22_s15), 0  ;;  %p163_p3 = pnand %p434_p0, %p162_p2 }
   0x6   : > { %p191_p4 = scmp.lt.s32.totalorder (!%p163_p3), %s520_s12, 3  ;;  %p436_p5 = scmp.ne.s32.totalorder (!%p163_p3), %s520_s12, 0 }
   0x7   : > { %166 = sbr.rel (%p163_p3) target bundleno = 763 (0x2fb), region = 32 }
   0xe   : > { %s192_s16 = scalar_select %p191_p4, %s520_s12, 3 }
   0xf   : > { %209 = sbr.rel (%p436_p5) target bundleno = 22 (0x16), region = 36  ;;  %vm210_vm0 = vcmask (!%p436_p5), 261120   ;;  %v530_v0 = vmov (!%p436_p5), 0.0  }
  0x10   : > { %s435_s17 = sshll.u32 %s192_s16, 3  ;;  %211 = vst.msk [vmem:[#allocation2] sm:$0xff] (!%p436_p5), %vm210_vm0, %v530_v0  ;;  %212 = vst.msk [vmem:[#allocation3] sm:$0xff] (!%p436_p5), %vm210_vm0, %v530_v0 }
  0x11   : > { %s197_s20 = scalar_lea.vmem %s617_s0, %s435_s17 }
  0x16 PF: > { %v216_v1 = vld [vmem:[%s619_s2] sm:$0xff]  ;;  %v217_v2 = vld [vmem:[%s619_s2 + $0x8] sm:$0xff]  ;;  %v218_v3 = vld [vmem:[%s619_s2 + $0x10] sm:$0xff]  ;;  %v531_v4 = vmov 0.0|0.0   ;;  %vm532_vm1 = vmmov 0   ;;  %v533_v7 = vmov 0.0   ;;  %v325_v23 = vstv %s520_s12 }
  0x17   : > { %460 = vmatprep.subr.bf16.mxu0 %v531_v4  ;;  %v461_v5 = vpack.c.bf16 %v217_v2, %v216_v1  ;;  %v219_v6 = vld [vmem:[%s619_s2 + $0x18] sm:$0xff]  ;;  %457 = vmatprep.mubr.msk.f32.mxu0 %vm532_vm1, %v533_v7  ;;  %v213_v9 = vld [vmem:[#allocation2] sm:$0xff]  ;;  %vm220_vm2 = vcmask 261120   ;;  %v534_v17 = vmov 0   ;;  %s535_s29 = smov 64   ;;  %v214_v21 = vld [vmem:[#allocation3] sm:$0xff] }
  0x18   : > { %v464_v8 = vpack.c.bf16 %v219_v6, %v218_v3  ;;  %v215_v10 = vld [vmem:[%s197_s20] sm:$0xff]  ;;  %498 = vset.pattern.permute.xlu1 %v534_v17  ;;  %499 = vset.pattern.permute.xlu0 %v534_v17  ;;  %s536_s30 = smov 32   ;;  %s537_s6 = smov 96  }
  0x19   : > { %462 = vmatpush3.bf16.msra.mxu0 %v461_v5  ;;  %v324_v22 = vld [vmem:[%s618_s1] sm:$0xff]  ;;  %p440_p6 = scmp.ne.s32.totalorder %s520_s12, 3 }
  0x1a   : > { %463 = vmatprep.subr.bf16.mxu0 %v531_v4  ;;  %vm326_vm3 = vcmp.lt.s32.totalorder %v325_v23, %v324_v22 }
  0x1b   : > { %v327_v26 = vsel %vm326_vm3, 1, %v534_v17 }
  0x1d   : > { %465 = vmatpush3.bf16.msra.mxu0 %v464_v8 }
  0x20   : > { %458 = vmatmul.mubr.msk.f32.vlgmr.msra.gmra.mrb[0].mxu0 %vm220_vm2, %v213_v9 }
  0xf3   : > { %v290_v11 = vpop.f32.mrb[0].mxu0 }
  0xf4   : > { %v294_v12 = vadd.f32 %v290_v11, %v215_v10  ;;  %v459_v13 = vpop.f32.mrb[1].mxu0 }
  0xf6   : > { %v438_v14 = vmul.f32 -1.442695, %v294_v12 }
  0xf8   : > { %500 = vpow2.f32 %v438_v14 }
 0x102   : > { %v501_v15 = vpop.eup %500 }
 0x103   : > { %v298_v16 = vadd.f32 1.0, %v501_v15 }
 0x105   : > { %502 = vrcp.f32 %v298_v16 }
 0x10f   : > { %v503_v18 = vpop.eup %502 }
 0x110   : > { %v301_v19 = vmul.f32 2.0, %v503_v18 }
 0x112   : > { %v439_v20 = vadd.f32 -1.0, %v301_v19 }
 0x114   : > { %309 = vrot.lane.b32.xlu0 %v439_v20, %s535_s29 }
 0x118   : > { %304 = vrot.lane.b32.xlu0 %v214_v21, %s536_s30 }
 0x186   : > { %v310_v24 = vpop.permute.xlu0 %309 }
 0x187   : > { %v312_v25 = vmul.f32 %v503_v18, %v310_v24 }
 0x189   : > { %314 = vrot.lane.b32.xlu1 %v312_v25, %s536_s30 }
 0x18a   : > { %v305_v27 = vpop.permute.xlu0 %304 }
 0x18b   : > { %v307_v28 = vmul.f32 %v503_v18, %v305_v27 }
 0x18d   : > { %329 = vperm.xlu1 %498, %v327_v26  }
 0x191   : > { %332 = vrot.lane.b32.xlu1 %v213_v9, %s537_s6 }
 0x1fb   : > { %v315_v29 = vpop.permute.xlu1 %314 }
 0x1fc   : > { %v317_v30 = vadd.f32 %v315_v29, %v307_v28 }
 0x1fe   : > { %504 = vtanh.f32 %v317_v30 }
 0x208   : > { %v505_v31 = vpop.eup %504 }
 0x209   : > { %320 = vrot.lane.b32.xlu0 %v505_v31, %s535_s29 }
 0x20c   : > { %v330_v32 = vpop.permute.xlu1 %329 }
 0x20d   : > { %vm331_vm4 = vcmp.eq.s32.totalorder %v330_v32, 1 }
 0x20e   : > { %v341_v33 = vsel %vm331_vm4, %v317_v30, %v305_v27 }
 0x20f   : > { %343 = vrot.lane.b32.xlu1 %v341_v33, %s537_s6 }
 0x210   : > { %v333_v35 = vpop.permute.xlu1 %332 }
 0x27b   : > { %v321_v34 = vpop.permute.xlu0 %320 }
 0x27c   : > { %v323_v36 = vmul.f32 %v503_v18, %v321_v34 }
 0x27e   : > { %v335_v37 = vsel %vm331_vm4, %v323_v36, %v333_v35 }
 0x27f   : > { %337 = vrot.lane.b32.xlu0 %v335_v37, %s536_s30 }
 0x281   : > { %v344_v38 = vpop.permute.xlu1 %343 }
 0x282   : > { %346 = vst.msk [vmem:[#allocation3] sm:$0xff] %vm220_vm2, %v344_v38 }
 0x2ec   : > { %350 = sbr.rel (%p440_p6) target bundleno = 763 (0x2fb), region = 40 }
 0x2f1   : > { %v338_v39 = vpop.permute.xlu0 %337 }
 0x2f2   : > { %340 = vst.msk [vmem:[#allocation2] sm:$0xff] %vm220_vm2, %v338_v39 }
 0x2f9   : > { %v351_v40 = vld [vmem:[#allocation2] sm:$0xff] }
 0x2fa   : > { %352 = vst.msk [vmem:[%s620_s3] sm:$0xff] %vm220_vm2, %v351_v40 }
 0x2fb PF: > { %s13_s14 = sadd.s32 1, %s528_s14   ;;  %s621_s12 = smov %s524_s13 }
 0x2fc   : > { %p10_p7 = scmp.ge.s32.totalorder %s13_s14, 6   ;;  %s622_s13 = smov %s624_s15 }
 0x2fe   :  { %12 = sbr.rel (!%p10_p7) target bundleno = 2 (0x2), region = 73 }

</bundles_post_ra>
